<compile_context>
chip_gen: v7x
topology: tpu7x:2x2x1
jax: 0.10.0
libtpu: 0.0.40
codegen_flags: <defaults>
</compile_context>

<pallas_src>
import jax
import jax.numpy as jnp
from jax.experimental import pallas as pl
from jax.experimental.pallas import tpu as pltpu


# ----------------------------- Pallas kernel --------------------------------
def _double_q_kernel(x_ref, w1_ref, b1_ref, w2_ref, b2_ref, w3_ref, b3_ref, q_ref):
    # Layer 1 — one MXU pass over the pre-concatenated [state, action] tile (bf16 in, f32 acc).
    h = jnp.dot(x_ref[...], w1_ref[...], preferred_element_type=jnp.float32) + b1_ref[...]
    h = jnp.maximum(h, 0.0).astype(jnp.bfloat16)                 # ReLU, bf16 for next MXU pass
    # Layer 2 — block-diagonal fused twin layer.
    h = jnp.dot(h, w2_ref[...], preferred_element_type=jnp.float32) + b2_ref[...]
    h = jnp.maximum(h, 0.0).astype(jnp.bfloat16)
    # Layer 3 — fused twin output heads (q1 -> lane 0, q2 -> lane 1), no final activation.
    q_ref[...] = (jnp.dot(h, w3_ref[...], preferred_element_type=jnp.float32)
                  + b3_ref[...]).astype(q_ref.dtype)


# --------------------------- one-time weight fusion ---------------------------
def fuse_double_q_params(params):
    """Fuse the two Q-MLPs into one wide / block-diagonal parameter set.

    Run ONCE (outside the per-call jit). Weights are cast to bf16 (MXU-native),
    biases stay f32 (bias + ReLU are done in f32 inside the kernel).
    """
    p1, p2 = params["q1"], params["q2"]
    h1 = p1["l1"]["w"].shape[1]
    h2 = p1["l2"]["w"].shape[1]

    # Layer 1: (D, 2*h1) — q1 columns [0:h1], q2 columns [h1:2*h1].
    w1 = jnp.concatenate([p1["l1"]["w"], p2["l1"]["w"]], axis=1)
    b1 = jnp.concatenate([p1["l1"]["b"], p2["l1"]["b"]], axis=1)

    # Layer 2: block-diagonal (2*h1, 2*h2).
    w2 = jnp.zeros((2 * h1, 2 * h2), jnp.float32)
    w2 = w2.at[:h1, :h2].set(p1["l2"]["w"]).at[h1:, h2:].set(p2["l2"]["w"])
    b2 = jnp.concatenate([p1["l2"]["b"], p2["l2"]["b"]], axis=1)

    # Layer 3: block-diagonal (2*h2, 2) — q1 -> lane 0, q2 -> lane 1.
    w3 = jnp.zeros((2 * h2, 2), jnp.float32)
    w3 = w3.at[:h2, 0:1].set(p1["l3"]["w"]).at[h2:, 1:2].set(p2["l3"]["w"])
    b3 = jnp.concatenate([p1["l3"]["b"], p2["l3"]["b"]], axis=1)

    return (
        w1.astype(jnp.bfloat16), b1.astype(jnp.float32),
        w2.astype(jnp.bfloat16), b2.astype(jnp.float32),
        w3.astype(jnp.bfloat16), b3.astype(jnp.float32),
    )


# ------------------------------ wrapper --------------------------------------
def _round_up(x, m):
    return ((x + m - 1) // m) * m


@jax.jit
def double_q_forward(state, action, fused_params):
    """Forward pass of DoubleQNetwork.

    `fused_params` comes from `fuse_double_q_params` (one-time preprocessing).
    Returns (q1, q2), each (B, 1) float32.
    """
    w1, b1, w2, b2, w3, b3 = fused_params

    # Single cheap wrapper-side concat + bf16 cast: one input DMA stream and one
    # layer-1 MXU pass in the kernel.
    x = jnp.concatenate([state, action], axis=1).astype(jnp.bfloat16)
    B, D = x.shape

    # Batch tile: single shot for small B (per-step overhead dominates); otherwise
    # >= 2 grid steps (so the "parallel" batch axis can span both v7x TensorCores),
    # capped at 2048 rows (bf16 tiles fit v5e's 16 MiB default scoped VMEM).
    if B <= 512:
        tb = B
    else:
        tb = min(2048, _round_up(pl.cdiv(B, 2), 8))
    grid = (pl.cdiv(B, tb),)

    def const_spec(shape):
        # Full-array block, same block every grid step -> weights stay resident in VMEM.
        return pl.BlockSpec(shape, lambda i: (0, 0))

    q = pl.pallas_call(
        _double_q_kernel,
        out_shape=jax.ShapeDtypeStruct((B, 2), jnp.float32),
        grid=grid,
        in_specs=[
            pl.BlockSpec((tb, D), lambda i: (i, 0)),   # [state, action] batch tile
            const_spec(w1.shape), const_spec(b1.shape),
            const_spec(w2.shape), const_spec(b2.shape),
            const_spec(w3.shape), const_spec(b3.shape),
        ],
        out_specs=pl.BlockSpec((tb, 2), lambda i: (i, 0)),
        compiler_params=pltpu.CompilerParams(
            dimension_semantics=("parallel",),
        ),
    )(x, w1, b1, w2, b2, w3, b3)

    # Cheap wrapper-side split of the lane-dense output slab.
    return q[:, 0:1], q[:, 1:2]


# --------------------------- parameter init -----------------------------------
def _init_linear(key, fan_in, fan_out):
    """PyTorch nn.Linear default init: U(-1/sqrt(fan_in), 1/sqrt(fan_in))."""
    kw, kb = jax.random.split(key)
    bound = 1.0 / jnp.sqrt(jnp.float32(fan_in))
    w = jax.random.uniform(kw, (fan_in, fan_out), jnp.float32, -bound, bound)
    b = jax.random.uniform(kb, (1, fan_out), jnp.float32, -bound, bound)
    return {"w": w, "b": b}


def init_double_q_params(key, n_observations, n_actions, hidden_sizes=(64, 32)):
    in_dim = n_observations + n_actions
    h1, h2 = hidden_sizes
    keys = jax.random.split(key, 6)
    return {
        "q1": {
            "l1": _init_linear(keys[0], in_dim, h1),
            "l2": _init_linear(keys[1], h1, h2),
            "l3": _init_linear(keys[2], h2, 1),
        },
        "q2": {
            "l1": _init_linear(keys[3], in_dim, h1),
            "l2": _init_linear(keys[4], h1, h2),
            "l3": _init_linear(keys[5], h2, 1),
        },
    }


# ------------------------------ reference -------------------------------------
def _reference_forward(state, action, params):
    x = jnp.concatenate([state, action], axis=1).astype(jnp.float32)

    def mlp(p):
        h = jnp.maximum(x @ p["l1"]["w"] + p["l1"]["b"], 0.0)
        h = jnp.maximum(h @ p["l2"]["w"] + p["l2"]["b"], 0.0)
        return h @ p["l3"]["w"] + p["l3"]["b"]

    return mlp(params["q1"]), mlp(params["q2"])


# -------------------------------- main -----------------------------------------
if __name__ == "__main__":
    n_observations = 8
    n_actions = 2

    key = jax.random.PRNGKey(0)
    k_params, k_state, k_action = jax.random.split(key, 3)

    params = init_double_q_params(k_params, n_observations, n_actions)
    fused = fuse_double_q_params(params)               # one-time preprocessing (hoisted)
    fused = jax.tree_util.tree_map(jax.block_until_ready, fused)

    # Tolerance is relaxed vs. the pure-f32 version because the MXU operands are bf16.
    ATOL = RTOL = 5e-2

    # --- small, single-tile case -------------------------------------------------
    batch = 4
    state = jax.random.normal(k_state, (batch, n_observations), jnp.float32)
    action = jax.random.normal(k_action, (batch, n_actions), jnp.float32)

    q1, q2 = double_q_forward(state, action, fused)
    q1 = jax.block_until_ready(q1)
    q2 = jax.block_until_ready(q2)

    r1, r2 = _reference_forward(state, action, params)
    assert q1.shape == (batch, 1) and q2.shape == (batch, 1)
    assert jnp.allclose(q1, r1, atol=ATOL, rtol=RTOL)
    assert jnp.allclose(q2, r2, atol=ATOL, rtol=RTOL)

    # --- multi-tile case (B not a multiple of the batch tile -> partial last block) ---
    batch2 = 520
    ks2, ka2 = jax.random.split(jax.random.PRNGKey(1))
    state2 = jax.random.normal(ks2, (batch2, n_observations), jnp.float32)
    action2 = jax.random.normal(ka2, (batch2, n_actions), jnp.float32)

    p1, p2 = double_q_forward(state2, action2, fused)
    p1 = jax.block_until_ready(p1)
    p2 = jax.block_until_ready(p2)

    rr1, rr2 = _reference_forward(state2, action2, params)
    assert p1.shape == (batch2, 1) and p2.shape == (batch2, 1)
    assert jnp.allclose(p1, rr1, atol=ATOL, rtol=RTOL)
    assert jnp.allclose(p2, rr2, atol=ATOL, rtol=RTOL)

    print("KERNEL_OK")
</pallas_src>

<mosaic_0001>
module attributes {stable_mosaic.version = 11 : i64} {
  func.func @_double_q_kernel(%arg0: i32, %arg1: memref<4x10xbf16, #tpu.memory_space<vmem>>, %arg2: memref<10x128xbf16, #tpu.memory_space<vmem>>, %arg3: memref<1x128xf32, #tpu.memory_space<vmem>>, %arg4: memref<128x64xbf16, #tpu.memory_space<vmem>>, %arg5: memref<1x64xf32, #tpu.memory_space<vmem>>, %arg6: memref<64x2xbf16, #tpu.memory_space<vmem>>, %arg7: memref<1x2xf32, #tpu.memory_space<vmem>>, %arg8: memref<4x2xf32, #tpu.memory_space<vmem>>) attributes {dimension_semantics = [#tpu.dimension_semantics<parallel>], iteration_bounds = array<i64: 1>, scalar_prefetch = 0 : i64, scratch_operands = 0 : i64, tpu.core_type = #tpu.core_type<tc>, window_params = [{transform_indices = @transform_0, window_bounds = array<i64: 4, 10>}, {pipeline_mode = #tpu.pipeline_mode<synchronous>, transform_indices = @transform_1, window_bounds = array<i64: 10, 128>}, {pipeline_mode = #tpu.pipeline_mode<synchronous>, transform_indices = @transform_2, window_bounds = array<i64: 1, 128>}, {pipeline_mode = #tpu.pipeline_mode<synchronous>, transform_indices = @transform_3, window_bounds = array<i64: 128, 64>}, {pipeline_mode = #tpu.pipeline_mode<synchronous>, transform_indices = @transform_4, window_bounds = array<i64: 1, 64>}, {pipeline_mode = #tpu.pipeline_mode<synchronous>, transform_indices = @transform_5, window_bounds = array<i64: 64, 2>}, {pipeline_mode = #tpu.pipeline_mode<synchronous>, transform_indices = @transform_6, window_bounds = array<i64: 1, 2>}, {transform_indices = @transform_7, window_bounds = array<i64: 4, 2>}]} {
    %c0 = arith.constant 0 : index
    %c0_0 = arith.constant 0 : index
    %0 = vector.load %arg1[%c0, %c0_0] : memref<4x10xbf16, #tpu.memory_space<vmem>>, vector<4x10xbf16>
    %c0_1 = arith.constant 0 : index
    %c0_2 = arith.constant 0 : index
    %1 = vector.load %arg2[%c0_1, %c0_2] : memref<10x128xbf16, #tpu.memory_space<vmem>>, vector<10x128xbf16>
    %cst = arith.constant dense<0.000000e+00> : vector<4x128xf32>
    %2 = tpu.matmul %0, %1, %cst {dimension_numbers = #tpu.dot_dimension_numbers<[1], [0], [0], [1], [0, 0, 1, 1], [], []>} : vector<4x10xbf16>, vector<10x128xbf16>, vector<4x128xf32> -> vector<4x128xf32>
    %c0_3 = arith.constant 0 : index
    %c0_4 = arith.constant 0 : index
    %3 = vector.load %arg3[%c0_3, %c0_4] : memref<1x128xf32, #tpu.memory_space<vmem>>, vector<1x128xf32>
    %4 = vector.broadcast %3 : vector<1x128xf32> to vector<4x128xf32>
    %5 = arith.addf %2, %4 : vector<4x128xf32>
    %cst_5 = arith.constant 0.000000e+00 : f32
    %6 = vector.broadcast %cst_5 : f32 to vector<4x128xf32>
    %7 = arith.maximumf %5, %6 : vector<4x128xf32>
    %8 = arith.truncf %7 : vector<4x128xf32> to vector<4x128xbf16>
    %c0_6 = arith.constant 0 : index
    %c0_7 = arith.constant 0 : index
    %9 = vector.load %arg4[%c0_6, %c0_7] : memref<128x64xbf16, #tpu.memory_space<vmem>>, vector<128x64xbf16>
    %cst_8 = arith.constant dense<0.000000e+00> : vector<4x64xf32>
    %10 = tpu.matmul %8, %9, %cst_8 {dimension_numbers = #tpu.dot_dimension_numbers<[1], [0], [0], [1], [0, 0, 1, 1], [], []>} : vector<4x128xbf16>, vector<128x64xbf16>, vector<4x64xf32> -> vector<4x64xf32>
    %c0_9 = arith.constant 0 : index
    %c0_10 = arith.constant 0 : index
    %11 = vector.load %arg5[%c0_9, %c0_10] : memref<1x64xf32, #tpu.memory_space<vmem>>, vector<1x64xf32>
    %12 = vector.broadcast %11 : vector<1x64xf32> to vector<4x64xf32>
    %13 = arith.addf %10, %12 : vector<4x64xf32>
    %cst_11 = arith.constant 0.000000e+00 : f32
    %14 = vector.broadcast %cst_11 : f32 to vector<4x64xf32>
    %15 = arith.maximumf %13, %14 : vector<4x64xf32>
    %16 = arith.truncf %15 : vector<4x64xf32> to vector<4x64xbf16>
    %c0_12 = arith.constant 0 : index
    %c0_13 = arith.constant 0 : index
    %17 = vector.load %arg6[%c0_12, %c0_13] : memref<64x2xbf16, #tpu.memory_space<vmem>>, vector<64x2xbf16>
    %cst_14 = arith.constant dense<0.000000e+00> : vector<4x2xf32>
    %18 = tpu.matmul %16, %17, %cst_14 {dimension_numbers = #tpu.dot_dimension_numbers<[1], [0], [0], [1], [0, 0, 1, 1], [], []>} : vector<4x64xbf16>, vector<64x2xbf16>, vector<4x2xf32> -> vector<4x2xf32>
    %c0_15 = arith.constant 0 : index
    %c0_16 = arith.constant 0 : index
    %19 = vector.load %arg7[%c0_15, %c0_16] : memref<1x2xf32, #tpu.memory_space<vmem>>, vector<1x2xf32>
    %20 = vector.broadcast %19 : vector<1x2xf32> to vector<4x2xf32>
    %21 = arith.addf %18, %20 : vector<4x2xf32>
    %c0_17 = arith.constant 0 : index
    %c0_18 = arith.constant 0 : index
    %22 = vector.load %arg8[%c0_17, %c0_18] : memref<4x2xf32, #tpu.memory_space<vmem>>, vector<4x2xf32>
    tpu.vector_store %arg8[%c0_17, %c0_18], %21 {strides = array<i32>} : memref<4x2xf32, #tpu.memory_space<vmem>>, vector<4x2xf32>,
    return
  }
  func.func @transform_0(%arg0: i32) -> (i32, i32) {
    %c0_i32 = arith.constant 0 : i32
    %c0_i32_0 = arith.constant 0 : i32
    return %arg0, %c0_i32 : i32, i32
  }
  func.func @transform_1(%arg0: i32) -> (i32, i32) {
    %c0_i32 = arith.constant 0 : i32
    %c0_i32_0 = arith.constant 0 : i32
    %c0_i32_1 = arith.constant 0 : i32
    return %c0_i32, %c0_i32_0 : i32, i32
  }
  func.func @transform_2(%arg0: i32) -> (i32, i32) {
    %c0_i32 = arith.constant 0 : i32
    %c0_i32_0 = arith.constant 0 : i32
    %c0_i32_1 = arith.constant 0 : i32
    return %c0_i32, %c0_i32_0 : i32, i32
  }
  func.func @transform_3(%arg0: i32) -> (i32, i32) {
    %c0_i32 = arith.constant 0 : i32
    %c0_i32_0 = arith.constant 0 : i32
    %c0_i32_1 = arith.constant 0 : i32
    return %c0_i32, %c0_i32_0 : i32, i32
  }
  func.func @transform_4(%arg0: i32) -> (i32, i32) {
    %c0_i32 = arith.constant 0 : i32
    %c0_i32_0 = arith.constant 0 : i32
    %c0_i32_1 = arith.constant 0 : i32
    return %c0_i32, %c0_i32_0 : i32, i32
  }
  func.func @transform_5(%arg0: i32) -> (i32, i32) {
    %c0_i32 = arith.constant 0 : i32
    %c0_i32_0 = arith.constant 0 : i32
    %c0_i32_1 = arith.constant 0 : i32
    return %c0_i32, %c0_i32_0 : i32, i32
  }
  func.func @transform_6(%arg0: i32) -> (i32, i32) {
    %c0_i32 = arith.constant 0 : i32
    %c0_i32_0 = arith.constant 0 : i32
    %c0_i32_1 = arith.constant 0 : i32
    return %c0_i32, %c0_i32_0 : i32, i32
  }
  func.func @transform_7(%arg0: i32) -> (i32, i32) {
    %c0_i32 = arith.constant 0 : i32
    %c0_i32_0 = arith.constant 0 : i32
    return %arg0, %c0_i32 : i32, i32
  }
}

</mosaic_0001>

<bundles_post_ra>
// kernel: double_q_forward.1
= control target key start
LH: loop header
LB: loop body
LE: loop exit
PB: predicated region body
PF: predicated region fallthrough
CT: control target
= control target key end

     0   :  { %vm46_vm0 = vcmask 1044480   ;;  %v381_v0 = vmov 0.0   ;;  %vm382_vm1 = vmmov 0   ;;  %vm42_vm2 = vcmask 80896   ;;  %s480_s1 = inlined_call_operand.vmem [shape: bf16[10,128], index: 1, kind: input, shape index: {}]   ;;  %s481_s3 = inlined_call_operand.vmem [shape: bf16[128,64], index: 3, kind: input, shape index: {}]   ;;  %s482_s0 = inlined_call_operand.vmem [shape: bf16[4,10], index: 0, kind: input, shape index: {}]   ;;  %s483_s5 = inlined_call_operand.vmem [shape: bf16[64,2], index: 5, kind: input, shape index: {}]   ;;  %s484_s2 = inlined_call_operand.vmem [shape: f32[1,128], index: 2, kind: input, shape index: {}]   ;;  %s485_s4 = inlined_call_operand.vmem [shape: f32[1,64], index: 4, kind: input, shape index: {}]   ;;  %s486_s6 = inlined_call_operand.vmem [shape: f32[1,2], index: 6, kind: input, shape index: {}]   ;;  %s487_s7 = inlined_call_operand.vmem [shape: f32[4,2], index: 7, kind: output, shape index: {}]  }
   0x1   :  { %328 = vmatprep.subr.bf16.mxu0 %v381_v0  ;;  %v368_v1 = vld [vmem:[%s480_s1] sm:$0x1f]   ;;  %330 = vmatprep.mubr.msk.bf16.mxu0 %vm382_vm1, %v381_v0  ;;  %v370_v5 = vld [vmem:[%s481_s3 + $0x8] sm:$0xff]   ;;  %v371_v6 = vld [vmem:[%s481_s3 + $0x10] sm:$0xff]   ;;  %vm244_vm3 = vcmask 523264   ;;  %vm288_vm4 = vcmask 11264  }
   0x2   :  { %334 = vmatprep.subr.bf16.mxu1 %v381_v0  ;;  %350 = vmatprep.mubr.msk.bf16.mxu1 %vm382_vm1, %v381_v0  ;;  %v48_v2 = vsel %vm46_vm0, %v368_v1, 0  ;;  %v369_v3 = vld [vmem:[%s481_s3] sm:$0xff]   ;;  %v372_v7 = vld [vmem:[%s481_s3 + $0x18] sm:$0xff]   ;;  %v374_v9 = vld [vmem:[%s481_s3 + $0x28] sm:$0xff]  }
   0x3   :  { %329 = vmatpush3.bf16.msra.mxu0 %v48_v2  ;;  %v27_v4 = vld [vmem:[%s482_s0] sm:$0x3]  ;;  %335 = vmatpush3.bf16.msra.mxu1 %v369_v3  ;;  %v375_v10 = vld [vmem:[%s481_s3 + $0x30] sm:$0xff]   ;;  %v376_v11 = vld [vmem:[%s481_s3 + $0x38] sm:$0xff]  }
   0x4   :  { %354 = vmatprep.subr.bf16.mxu0 %v381_v0  ;;  %336 = vmatprep.subr.bf16.mxu1 %v381_v0  ;;  %v373_v8 = vld [vmem:[%s481_s3 + $0x20] sm:$0xff]   ;;  %v378_v13 = vld [vmem:[%s483_s5 + $0x8] sm:$0xff]   ;;  %v379_v22 = vld [vmem:[%s483_s5 + $0x10] sm:$0xff]  }
   0x5   :  { %v377_v12 = vld [vmem:[%s483_s5] sm:$0xff]   ;;  %v380_v23 = vld [vmem:[%s483_s5 + $0x18] sm:$0xff]  }
   0x6   :  { %331 = vmatmul.mubr.msk.bf16.vlgmr.msra.gmra.mrb[0].mxu0 %vm42_vm2, %v27_v4  ;;  %v294_v14 = vld [vmem:[%s484_s2] ss:$0 sm:$0xff] }
   0x7   :  { %362 = vmatprep.mubr.msk.bf16.mxu0 %vm382_vm1, %v381_v0  ;;  %337 = vmatpush3.bf16.msra.mxu1 %v370_v5  ;;  %v297_v24 = vld [vmem:[%s485_s4] ss:$0 sm:$0xff] }
   0x8   :  { %338 = vmatprep.subr.bf16.mxu1 %v381_v0  ;;  %355 = vmatpush3.bf16.msra.mxu0 %v377_v12  ;;  %v306_v32 = vld [vmem:[%s486_s6] ss:$0 sm:$0xff] }
   0x9   :  { %356 = vmatprep.subr.bf16.mxu0 %v381_v0 }
   0xb   :  { %339 = vmatpush3.bf16.msra.mxu1 %v371_v6 }
   0xc   :  { %340 = vmatprep.subr.bf16.mxu1 %v381_v0  ;;  %357 = vmatpush3.bf16.msra.mxu0 %v378_v13 }
   0xd   :  { %358 = vmatprep.subr.bf16.mxu0 %v381_v0 }
   0xf   :  { %341 = vmatpush3.bf16.msra.mxu1 %v372_v7 }
  0x10   :  { %342 = vmatprep.subr.bf16.mxu1 %v381_v0  ;;  %359 = vmatpush3.bf16.msra.mxu0 %v379_v22 }
  0x11   :  { %360 = vmatprep.subr.bf16.mxu0 %v381_v0 }
  0x13   :  { %343 = vmatpush3.bf16.msra.mxu1 %v373_v8 }
  0x14   :  { %344 = vmatprep.subr.bf16.mxu1 %v381_v0  ;;  %361 = vmatpush3.bf16.msra.mxu0 %v380_v23 }
  0x17   :  { %345 = vmatpush3.bf16.msra.mxu1 %v374_v9 }
  0x18   :  { %346 = vmatprep.subr.bf16.mxu1 %v381_v0 }
  0x1b   :  { %347 = vmatpush3.bf16.msra.mxu1 %v375_v10 }
  0x1c   :  { %348 = vmatprep.subr.bf16.mxu1 %v381_v0 }
  0x1f   :  { %349 = vmatpush3.bf16.msra.mxu1 %v376_v11 }
  0xd9   :  { %v84_v15 = vpop.f32.mrb[0].mxu0 }
  0xda   :  { %v85_v16 = vadd.f32 %v294_v14, %v84_v15  ;;  %v332_v17 = vpop.f32.mrb[1].mxu0 }
  0xdb   :  { %v87_v18 = vpop.f32.mrb[2].mxu0 }
  0xdc   :  { %v90_v19 = vmax.f32 %v85_v16, 0.0  ;;  %v333_v20 = vpop.f32.mrb[3].mxu0 }
  0xde   :  { %v91_v21 = vpack.c.bf16 %v90_v19, %v90_v19 }
  0xe0   :  { %351 = vmatmul.mubr.bf16.vlgmr.msra.gmra.mrb[0].mxu1 %v91_v21 }
 0x1b3   :  { %v197_v25 = vpop.f32.mrb[0].mxu1 }
 0x1b4   :  { %v198_v26 = vadd.f32 %v297_v24, %v197_v25  ;;  %v352_v27 = vpop.f32.mrb[1].mxu1 }
 0x1b5   :  { %v200_v28 = vpop.f32.mrb[2].mxu1 }
 0x1b6   :  { %v203_v29 = vmax.f32 %v198_v26, 0.0  ;;  %v353_v30 = vpop.f32.mrb[3].mxu1 }
 0x1b8   :  { %v204_v31 = vpack.c.bf16 %v203_v29, %v203_v29 }
 0x1ba   :  { %363 = vmatmul.mubr.msk.bf16.vlgmr.msra.gmra.mrb[4].mxu0 %vm244_vm3, %v204_v31 }
 0x28d   :  { %v282_v33 = vpop.f32.mrb[4].mxu0 }
 0x28e   :  { %v283_v34 = vadd.f32 %v306_v32, %v282_v33  ;;  %v364_v35 = vpop.f32.mrb[5].mxu0 }
 0x28f   :  { %v285_v36 = vpop.f32.mrb[6].mxu0 }
 0x290   :  { %289 = vst.msk [vmem:[%s487_s7] sm:$0xf] %vm288_vm4, %v283_v34  ;;  %v365_v37 = vpop.f32.mrb[7].mxu0 }

</bundles_post_ra>
